<compile_context>
chip_gen: v5e
topology: v5e:2x2
jax: 0.10.0
libtpu: 0.0.40
codegen_flags: <defaults>
</compile_context>

<pallas_src>
import functools

import jax
import jax.numpy as jnp
from jax.experimental import pallas as pl
from jax.experimental.pallas import tpu as pltpu


LANES = 128
BLOCK_BYTES_CAP = 6 * 1024 * 1024       # per-block cap (v7x-safe with 2x in + 2x out)
VMEM_BUDGET = 28 * 1024 * 1024          # budget for pipeline buffers (fits 32 MiB scoped)
VMEM_LIMIT = 32 * 1024 * 1024           # explicit scoped-VMEM limit (v5e default is 16 MiB)
DEFAULT_ROWS_PER_TILE = 2048            # 2048*128*4B = 1 MiB f32 tile for the tiled path


# ---------------------------------------------------------------------------
# Kernels
# ---------------------------------------------------------------------------

def _fused_layernorm_kernel(x_ref, g_ref, b_ref, o_ref, *, eps, n_elems):
    """Whole-sample(s) block: single-pass stats + folded scale/shift."""
    x = x_ref[...].astype(jnp.float32)                       # (BN, R, 128)
    s1 = jnp.sum(x, axis=(1, 2), keepdims=True)              # (BN, 1, 1)
    s2 = jnp.sum(x * x, axis=(1, 2), keepdims=True)          # (BN, 1, 1)
    mean = s1 / n_elems
    var = jnp.maximum((s2 - n_elems * mean * mean) / max(n_elems - 1.0, 1.0), 0.0)
    inv = 1.0 / (jnp.sqrt(var) + eps)                        # eps added to std (torch)
    g = g_ref[...].astype(jnp.float32)[None]                 # (1, R, 1) or (1, R, 128)
    b = b_ref[...].astype(jnp.float32)[None]
    a = g * inv                                              # fold: out = x*a + c
    c = b - mean * a
    o_ref[...] = (x * a + c).astype(o_ref.dtype)


def _stats_kernel(x_ref, s1_ref, s2_ref):
    """Tiled pass 1: accumulate per-sample sum / sum-of-squares over row tiles."""
    @pl.when(pl.program_id(1) == 0)
    def _():
        s1_ref[...] = jnp.zeros_like(s1_ref)
        s2_ref[...] = jnp.zeros_like(s2_ref)

    x = x_ref[...].astype(jnp.float32)                       # (1, TR, 128)
    s1_ref[...] += jnp.sum(x, axis=(1, 2), keepdims=True)
    s2_ref[...] += jnp.sum(x * x, axis=(1, 2), keepdims=True)


def _apply_kernel(x_ref, a_ref, c_ref, o_ref):
    """Tiled pass 2: out = x*a + c with per-row folded coefficients."""
    x = x_ref[...].astype(jnp.float32)                       # (1, TR, 128)
    a = a_ref[...].astype(jnp.float32)                       # (1, TR, 1) or (1, TR, 128)
    c = c_ref[...].astype(jnp.float32)
    o_ref[...] = (x * a + c).astype(o_ref.dtype)


# ---------------------------------------------------------------------------
# Wrappers
# ---------------------------------------------------------------------------

def _pick_batch_block(n, sample_bytes, aux_bytes, block_cap, vmem_budget):
    """Largest divisor of n that fits the caps, preferring >= 2 grid steps (v7x)."""
    best = 1
    for bn in range(1, n + 1):
        if n % bn:
            continue
        if bn * sample_bytes > block_cap:
            break
        if 4 * bn * sample_bytes + 2 * aux_bytes > vmem_budget:
            break
        if n // bn >= 2 or n == 1:
            best = bn
    return best


def _layer_norm_fused(x_rows, g_map, b_map, eps, n_elems, bn):
    n, rp, lanes = x_rows.shape
    kernel = functools.partial(_fused_layernorm_kernel,
                               eps=float(eps), n_elems=float(n_elems))
    return pl.pallas_call(
        kernel,
        out_shape=jax.ShapeDtypeStruct((n, rp, lanes), x_rows.dtype),
        grid_spec=pltpu.PrefetchScalarGridSpec(
            num_scalar_prefetch=0,
            grid=(n // bn,),
            in_specs=[
                pl.BlockSpec((bn, rp, lanes), lambda i: (i, 0, 0)),
                pl.BlockSpec(g_map.shape, lambda i: (0, 0)),
                pl.BlockSpec(b_map.shape, lambda i: (0, 0)),
            ],
            out_specs=pl.BlockSpec((bn, rp, lanes), lambda i: (i, 0, 0)),
        ),
        compiler_params=pltpu.CompilerParams(
            dimension_semantics=("parallel",),
            vmem_limit_bytes=VMEM_LIMIT,
        ),
    )(x_rows, g_map, b_map)


def _layer_norm_tiled(x_rows, g_map, b_map, eps, n_elems, rows_per_tile):
    n, rp, lanes = x_rows.shape
    tr = max(8, (int(rows_per_tile) // 8) * 8)
    t = -(-rp // tr)
    rt = t * tr
    if rt != rp:
        # Zero-padded rows do not perturb sum/sumsq (n_elems stays the true count).
        x_rows = jnp.pad(x_rows, ((0, 0), (0, rt - rp), (0, 0)))
        g_map = jnp.pad(g_map, ((0, rt - rp), (0, 0)))
        b_map = jnp.pad(b_map, ((0, rt - rp), (0, 0)))

    # Pass 1: per-sample sum & sum-of-squares (reduction axis last, "arbitrary").
    s1, s2 = pl.pallas_call(
        _stats_kernel,
        out_shape=(jax.ShapeDtypeStruct((n, 1, 1), jnp.float32),
                   jax.ShapeDtypeStruct((n, 1, 1), jnp.float32)),
        grid_spec=pltpu.PrefetchScalarGridSpec(
            num_scalar_prefetch=0,
            grid=(n, t),
            in_specs=[pl.BlockSpec((1, tr, lanes), lambda i, k: (i, k, 0))],
            out_specs=(pl.BlockSpec((1, 1, 1), lambda i, k: (i, 0, 0)),
                       pl.BlockSpec((1, 1, 1), lambda i, k: (i, 0, 0))),
        ),
        compiler_params=pltpu.CompilerParams(
            dimension_semantics=("parallel", "arbitrary"),
            vmem_limit_bytes=VMEM_LIMIT,
        ),
    )(x_rows)

    # Fold stats + affine into tiny per-(sample,row) coefficients (plain JAX, ~size N*R).
    ne = float(n_elems)
    mean = s1.reshape(n) / ne
    var = jnp.maximum((s2.reshape(n) - ne * mean * mean) / max(ne - 1.0, 1.0), 0.0)
    inv = 1.0 / (jnp.sqrt(var) + float(eps))
    a_map = g_map[None, :, :] * inv[:, None, None]           # (N, Rt, Wg)
    c_map = b_map[None, :, :] - mean[:, None, None] * a_map
    wg = a_map.shape[-1]

    # Pass 2: normalize tile-by-tile; both grid axes parallel (keeps v7x cores busy).
    out = pl.pallas_call(
        _apply_kernel,
        out_shape=jax.ShapeDtypeStruct(x_rows.shape, x_rows.dtype),
        grid_spec=pltpu.PrefetchScalarGridSpec(
            num_scalar_prefetch=0,
            grid=(n, t),
            in_specs=[
                pl.BlockSpec((1, tr, lanes), lambda i, k: (i, k, 0)),
                pl.BlockSpec((1, tr, wg), lambda i, k: (i, k, 0)),
                pl.BlockSpec((1, tr, wg), lambda i, k: (i, k, 0)),
            ],
            out_specs=pl.BlockSpec((1, tr, lanes), lambda i, k: (i, k, 0)),
        ),
        compiler_params=pltpu.CompilerParams(
            dimension_semantics=("parallel", "parallel"),
            vmem_limit_bytes=VMEM_LIMIT,
        ),
    )(x_rows, a_map, c_map)
    return out


def layer_norm_pallas(x, gamma, beta, eps=1e-5, affine=True,
                      force_tiled=False, rows_per_tile=DEFAULT_ROWS_PER_TILE):
    """x: (N, C, H, W). gamma/beta: (C,). Matches the PyTorch LayerNorm used by
    the SPADE decoder: per-sample mean/std over C*H*W, unbiased std, eps added
    to the std, per-channel affine."""
    n, c, h, w = x.shape
    l = h * w
    n_elems = c * l
    itemsize = jnp.dtype(x.dtype).itemsize

    # Lane-dense layout: per-sample flatten, zero-pad to a multiple of 128 lanes.
    rp = -(-n_elems // LANES)
    pad = rp * LANES - n_elems
    x_flat = x.reshape(n, n_elems)
    if pad:
        x_flat = jnp.pad(x_flat, ((0, 0), (0, pad)))         # zeros: stats unaffected
    x_rows = x_flat.reshape(n, rp, LANES)

    # Per-row gamma/beta maps when L is lane-aligned, else per-element maps.
    if affine:
        if l % LANES == 0:
            g_map = jnp.repeat(gamma.astype(jnp.float32), l // LANES).reshape(rp, 1)
            b_map = jnp.repeat(beta.astype(jnp.float32), l // LANES).reshape(rp, 1)
        else:
            g_flat = jnp.repeat(gamma.astype(jnp.float32), l)
            b_flat = jnp.repeat(beta.astype(jnp.float32), l)
            if pad:
                g_flat = jnp.pad(g_flat, (0, pad))
                b_flat = jnp.pad(b_flat, (0, pad))
            g_map = g_flat.reshape(rp, LANES)
            b_map = b_flat.reshape(rp, LANES)
    else:
        g_map = jnp.ones((rp, 1), jnp.float32)
        b_map = jnp.zeros((rp, 1), jnp.float32)

    sample_bytes = rp * LANES * itemsize
    aux_bytes = 2 * int(g_map.size) * 4
    fits = (sample_bytes <= BLOCK_BYTES_CAP and
            4 * sample_bytes + 2 * aux_bytes <= VMEM_BUDGET)

    if force_tiled or not fits:
        out_rows = _layer_norm_tiled(x_rows, g_map, b_map, eps, n_elems, rows_per_tile)
    else:
        bn = _pick_batch_block(n, sample_bytes, aux_bytes, BLOCK_BYTES_CAP, VMEM_BUDGET)
        out_rows = _layer_norm_fused(x_rows, g_map, b_map, eps, n_elems, bn)

    return out_rows.reshape(n, -1)[:, :n_elems].reshape(n, c, h, w)


def layer_norm_ref(x, gamma, beta, eps=1e-5, affine=True):
    """Pure-JAX reference mirroring the PyTorch forward."""
    n = x.shape[0]
    xf = x.reshape(n, -1)
    mean = jnp.mean(xf, axis=1)
    std = jnp.sqrt(jnp.var(xf, axis=1, ddof=1))               # unbiased, like torch.std
    shape = (-1,) + (1,) * (x.ndim - 1)
    xn = (x - mean.reshape(shape)) / (std.reshape(shape) + eps)
    if affine:
        ashape = (1, -1) + (1,) * (x.ndim - 2)
        xn = xn * gamma.reshape(ashape) + beta.reshape(ashape)
    return xn


# TODO(synk): the rest of SpadeDecoder (Conv2d stacks, nearest upsample,
# spectral-norm power iteration) is left to XLA; only the LayerNorm stage is a
# Pallas kernel here.

if __name__ == "__main__":
    key = jax.random.PRNGKey(0)
    kx, kg, kx2, kg2, kx3, kg3 = jax.random.split(key, 6)

    # Test 1: small SPADE-ish activation, lane-dense fused single-call path.
    N, C, H, W = 2, 4, 16, 16
    x = jax.random.normal(kx, (N, C, H, W), dtype=jnp.float32)
    gamma = jax.random.uniform(kg, (C,), dtype=jnp.float32)   # torch .uniform_()
    beta = jnp.zeros((C,), dtype=jnp.float32)                 # zeros
    out = jax.block_until_ready(layer_norm_pallas(x, gamma, beta, eps=1e-5, affine=True))
    ref = layer_norm_ref(x, gamma, beta, eps=1e-5, affine=True)
    assert out.shape == (N, C, H, W)
    assert jnp.allclose(out, ref, atol=1e-5, rtol=1e-5), "fused path mismatch"

    # Test 2: force the two-pass L-tiled path (used when a sample exceeds VMEM).
    N2, C2, H2, W2 = 2, 8, 16, 16
    x2 = jax.random.normal(kx2, (N2, C2, H2, W2), dtype=jnp.float32)
    gamma2 = jax.random.uniform(kg2, (C2,), dtype=jnp.float32)
    beta2 = jnp.zeros((C2,), dtype=jnp.float32)
    out2 = jax.block_until_ready(
        layer_norm_pallas(x2, gamma2, beta2, force_tiled=True, rows_per_tile=8))
    ref2 = layer_norm_ref(x2, gamma2, beta2)
    assert jnp.allclose(out2, ref2, atol=1e-5, rtol=1e-5), "tiled path mismatch"

    # Test 3: spatial size not a multiple of 128 lanes (zero-padded slab).
    N3, C3, H3, W3 = 2, 3, 10, 10
    x3 = jax.random.normal(kx3, (N3, C3, H3, W3), dtype=jnp.float32)
    gamma3 = jax.random.uniform(kg3, (C3,), dtype=jnp.float32)
    beta3 = jnp.zeros((C3,), dtype=jnp.float32)
    out3 = jax.block_until_ready(layer_norm_pallas(x3, gamma3, beta3))
    ref3 = layer_norm_ref(x3, gamma3, beta3)
    assert jnp.allclose(out3, ref3, atol=1e-5, rtol=1e-5), "padded path mismatch"

    print("KERNEL_OK")
</pallas_src>

<mosaic_0001>
module attributes {stable_mosaic.version = 11 : i64} {
  func.func @_fused_layernorm_kernel(%arg0: i32, %arg1: memref<1x8x128xf32, #tpu.memory_space<vmem>>, %arg2: memref<8x1xf32, #tpu.memory_space<vmem>>, %arg3: memref<8x1xf32, #tpu.memory_space<vmem>>, %arg4: memref<1x8x128xf32, #tpu.memory_space<vmem>>) attributes {dimension_semantics = [#tpu.dimension_semantics<parallel>], iteration_bounds = array<i64: 2>, scalar_prefetch = 0 : i64, scratch_operands = 0 : i64, tpu.core_type = #tpu.core_type<tc>, window_params = [{transform_indices = @transform_0, window_bounds = array<i64: 1, 8, 128>}, {pipeline_mode = #tpu.pipeline_mode<synchronous>, transform_indices = @transform_1, window_bounds = array<i64: 8, 1>}, {pipeline_mode = #tpu.pipeline_mode<synchronous>, transform_indices = @transform_2, window_bounds = array<i64: 8, 1>}, {transform_indices = @transform_3, window_bounds = array<i64: 1, 8, 128>}]} {
    %c0 = arith.constant 0 : index
    %c0_0 = arith.constant 0 : index
    %c0_1 = arith.constant 0 : index
    %0 = vector.load %arg1[%c0, %c0_0, %c0_1] : memref<1x8x128xf32, #tpu.memory_space<vmem>>, vector<1x8x128xf32>
    %cst = arith.constant dense<0.000000e+00> : vector<1xf32>
    %1 = vector.multi_reduction <add>, %0, %cst [1, 2] : vector<1x8x128xf32> to vector<1xf32>
    %2 = vector.shape_cast %1 : vector<1xf32> to vector<1x1x1xf32>
    %3 = arith.mulf %0, %0 : vector<1x8x128xf32>
    %cst_2 = arith.constant dense<0.000000e+00> : vector<1xf32>
    %4 = vector.multi_reduction <add>, %3, %cst_2 [1, 2] : vector<1x8x128xf32> to vector<1xf32>
    %5 = vector.shape_cast %4 : vector<1xf32> to vector<1x1x1xf32>
    %cst_3 = arith.constant 1.024000e+03 : f32
    %6 = vector.broadcast %cst_3 : f32 to vector<1x1x1xf32>
    %7 = arith.divf %2, %6 : vector<1x1x1xf32>
    %cst_4 = arith.constant 1.024000e+03 : f32
    %8 = vector.broadcast %cst_4 : f32 to vector<1x1x1xf32>
    %9 = arith.mulf %8, %7 : vector<1x1x1xf32>
    %10 = arith.mulf %9, %7 : vector<1x1x1xf32>
    %11 = arith.subf %5, %10 : vector<1x1x1xf32>
    %cst_5 = arith.constant 1.023000e+03 : f32
    %12 = vector.broadcast %cst_5 : f32 to vector<1x1x1xf32>
    %13 = arith.divf %11, %12 : vector<1x1x1xf32>
    %cst_6 = arith.constant 0.000000e+00 : f32
    %14 = vector.broadcast %cst_6 : f32 to vector<1x1x1xf32>
    %15 = arith.maximumf %13, %14 : vector<1x1x1xf32>
    %16 = math.sqrt %15 : vector<1x1x1xf32>
    %cst_7 = arith.constant 9.99999974E-6 : f32
    %17 = vector.broadcast %cst_7 : f32 to vector<1x1x1xf32>
    %18 = arith.addf %16, %17 : vector<1x1x1xf32>
    %cst_8 = arith.constant 1.000000e+00 : f32
    %19 = vector.broadcast %cst_8 : f32 to vector<1x1x1xf32>
    %20 = arith.divf %19, %18 : vector<1x1x1xf32>
    %c0_9 = arith.constant 0 : index
    %c0_10 = arith.constant 0 : index
    %21 = vector.load %arg2[%c0_9, %c0_10] : memref<8x1xf32, #tpu.memory_space<vmem>>, vector<8x1xf32>
    %22 = vector.shape_cast %21 : vector<8x1xf32> to vector<1x8x1xf32>
    %c0_11 = arith.constant 0 : index
    %c0_12 = arith.constant 0 : index
    %23 = vector.load %arg3[%c0_11, %c0_12] : memref<8x1xf32, #tpu.memory_space<vmem>>, vector<8x1xf32>
    %24 = vector.shape_cast %23 : vector<8x1xf32> to vector<1x8x1xf32>
    %25 = vector.broadcast %20 : vector<1x1x1xf32> to vector<1x8x1xf32>
    %26 = arith.mulf %22, %25 : vector<1x8x1xf32>
    %27 = vector.broadcast %7 : vector<1x1x1xf32> to vector<1x8x1xf32>
    %28 = arith.mulf %27, %26 : vector<1x8x1xf32>
    %29 = arith.subf %24, %28 : vector<1x8x1xf32>
    %30 = vector.broadcast %26 : vector<1x8x1xf32> to vector<1x8x128xf32>
    %31 = arith.mulf %0, %30 : vector<1x8x128xf32>
    %32 = vector.broadcast %29 : vector<1x8x1xf32> to vector<1x8x128xf32>
    %33 = arith.addf %31, %32 : vector<1x8x128xf32>
    %c0_13 = arith.constant 0 : index
    %c0_14 = arith.constant 0 : index
    %c0_15 = arith.constant 0 : index
    %34 = vector.load %arg4[%c0_13, %c0_14, %c0_15] : memref<1x8x128xf32, #tpu.memory_space<vmem>>, vector<1x8x128xf32>
    tpu.vector_store %arg4[%c0_13, %c0_14, %c0_15], %33 {strides = array<i32>} : memref<1x8x128xf32, #tpu.memory_space<vmem>>, vector<1x8x128xf32>,
    return
  }
  func.func @transform_0(%arg0: i32) -> (i32, i32, i32) {
    %c0_i32 = arith.constant 0 : i32
    %c0_i32_0 = arith.constant 0 : i32
    %c0_i32_1 = arith.constant 0 : i32
    return %arg0, %c0_i32, %c0_i32_0 : i32, i32, i32
  }
  func.func @transform_1(%arg0: i32) -> (i32, i32) {
    %c0_i32 = arith.constant 0 : i32
    %c0_i32_0 = arith.constant 0 : i32
    %c0_i32_1 = arith.constant 0 : i32
    return %c0_i32, %c0_i32_0 : i32, i32
  }
  func.func @transform_2(%arg0: i32) -> (i32, i32) {
    %c0_i32 = arith.constant 0 : i32
    %c0_i32_0 = arith.constant 0 : i32
    %c0_i32_1 = arith.constant 0 : i32
    return %c0_i32, %c0_i32_0 : i32, i32
  }
  func.func @transform_3(%arg0: i32) -> (i32, i32, i32) {
    %c0_i32 = arith.constant 0 : i32
    %c0_i32_0 = arith.constant 0 : i32
    %c0_i32_1 = arith.constant 0 : i32
    return %arg0, %c0_i32, %c0_i32_0 : i32, i32, i32
  }
}

</mosaic_0001>

<bundles_post_ra>
// kernel: tpu_custom_call.1
= control target key start
LH: loop header
LB: loop body
LE: loop exit
PB: predicated region body
PF: predicated region fallthrough
CT: control target
= control target key end

     0   :  { %8 = vsyncpa [#allocation3], 0  ;;  %s571_s0 = inlined_call_operand.vmem [shape: f32[2,8,128], index: 0, kind: input, shape index: {}]   ;;  %s572_s1 = inlined_call_operand.vmem [shape: f32[8,1], index: 1, kind: input, shape index: {}]   ;;  %s573_s2 = inlined_call_operand.vmem [shape: f32[8,1], index: 2, kind: input, shape index: {}]   ;;  %s574_s3 = inlined_call_operand.hbm [shape: f32[2,8,128], index: 3, kind: output, shape index: {}]  }
   0x1   :  { %10 = vsyncpa [#allocation3 + $0x1], 0  ;;  %s474_s12 = smov 0   ;;  %s476_s13 = smov 0  }
   0x2   :  { %s478_s14 = smov 0   ;;  %s480_s15 = smov 0  }
   0x3 LB: > { %s495_s16 = sadd.s32 4294967295, %s449_s15   ;;  %s325_s17 = sadd.s32 4294967294, %s449_s15   ;;  %s449_s15 = sphi %s480_s15, %s580_s15   ;;  %s445_s14 = sphi %s478_s14, %s579_s14   ;;  %s441_s13 = sphi %s476_s13, %s578_s13   ;;  %s437_s12 = sphi %s474_s12, %s577_s12  }
   0x4   : > { %s499_s18 = sadd.s32 1, %s449_s15   ;;  %s91_s19 = sadd.s32 1, %s445_s14 }
   0x5   : > { %s88_s20 = ssub.s32 %s449_s15, %s499_s18  ;;  %p101_p0 = scmp.ne.s32.totalorder %s445_s14, %s441_s13 }
   0x6   : > { %p89_p1 = scmp.eq.s32.totalorder %s88_s20, 0  ;;  %p102_p2 = scmp.eq.s32.totalorder %s495_s16, 1 }
   0x7   : > { %p107_p3 = scmp.ne.s32.totalorder %s441_s13, %s437_s12  ;;  %p108_p4 = scmp.eq.s32.totalorder %s325_s17, 1 }
   0x8   : > { %s510_s21 = scalar_select %p89_p1, %s445_s14, %s91_s19  }
   0x9   : > { %p512_p5 = por %p102_p2, %p101_p0  ;;  %p516_p6 = por %p108_p4, %p107_p3 }
   0xa   : > { %p328_p7 = scmp.ge.s32.totalorder %s449_s15, 1  ;;  %p139_p8 = scmp.lt.s32.totalorder %s449_s15, 3 }
   0xc   : > { %p140_p9 = pnand %p328_p7, %p139_p8 }
   0xd   : > { %p162_p10 = scmp.lt.s32.totalorder (!%p140_p9), %s495_s16, 1  ;;  %s159_s6 = sand.u32 (!%p140_p9), 1, %s441_s13  }
   0xe   : > { %143 = sbr.rel (%p140_p9) target bundleno = 336 (0x150), region = 32  ;;  %s329_s7 = sshll.u32 (!%p140_p9), %s159_s6, 3 }
   0xf   : > { %s332_s8 = sshll.u32 (!%p140_p9), %s495_s16, 3  ;;  %s161_s17 = scalar_lea.vmem (!%p140_p9), [#allocation2], %s329_s7 }
  0x10   : > { %s261_s11 = scalar_lea.hbm (!%p140_p9), %s574_s3, %s332_s8  ;;  %s263_s19 = sshll.u32 (!%p140_p9), %s161_s17, 4  ;;  %s264_s19 = int_to_ptr.vmem [resolvable:$true] %s263_s19 }
  0x11   : > { %s265_s20 = sshll.u32 (!%p140_p9), %s261_s11, 4  ;;  %s266_s20 = int_to_ptr.hbm [resolvable:$true] %s265_s20 }
  0x13   : > { %s163_s24 = scalar_select %p162_p10, %s495_s16, 1  ;;  %v451_v2 = vmov 1024.0   ;;  %v452_v5 = vmov 1023.0   ;;  %v453_v6 = vmov 0   ;;  %v232_v56 = vld [vmem:[%s572_s1] sm:$0xff] }
  0x14   : > { %379 = vrcp.f32 %v451_v2  ;;  %377 = vset.pattern.permute.xlu1 %v453_v6  ;;  %378 = vset.pattern.permute.xlu0 %v453_v6  ;;  %v233_v61 = vld [vmem:[%s573_s2] sm:$0xff] }
  0x15   : > { %s330_s25 = sshll.u32 %s163_s24, 3  ;;  %381 = vrcp.f32 %v452_v5  ;;  %s251_s24 = scalar_lea.sflag [#allocation3], %s159_s6 }
  0x16   : > { %s165_s28 = scalar_lea.vmem %s571_s0, %s330_s25  ;;  %s401_s25 = sshra.s32 %s266_s20, 4  ;;  %s402_s25 = int_to_ptr.hbm [resolvable:$true] %s401_s25 }
  0x17   : > { %v527_v0 = vld [vmem:[%s165_s28] sm:$0xff]  ;;  %s403_s26 = scalar_lea.hbm %s402_s25, 8  ;;  %s407_s28 = scalar_lea.hbm %s574_s3, 16 }
  0x18   : > { %167 = vadd.xlane.f32.xlu0 %v527_v0  ;;  %v175_v1 = vmul.f32 %v527_v0, %v527_v0  ;;  %p404_p11 = scmp.ne.s32.totalorder %s402_s25, %s403_s26  ;;  %p408_p0 = scmp.lt.s32.totalorder %s402_s25, %s574_s3 }
  0x19   : > { %p409_p1 = scmp.lt.s32.totalorder %s407_s28, %s403_s26 }
  0x1a   : > { %v380_v3 = vpop.eup %379  ;;  %p405_p12 = pnand %p404_p11, %p512_p5 }
  0x1b   : > { %v185_v4 = vmul.f32 1024.0, %v380_v3  ;;  %v382_v9 = vpop.eup %381  ;;  %vm189_vm0 = vweird.f32 %v380_v3  ;;  %p410_p2 = por %p409_p1, %p408_p0 }
  0x1c   : > { %v196_v13 = vmul.f32 1023.0, %v382_v9  ;;  %vm200_vm1 = vweird.f32 %v382_v9  ;;  %p406_p13 = pneg %p405_p12 }
  0x1d   : > { %v186_v7 = vsub.f32 1.0, %v185_v4 }
  0x1e   : > { %v197_v17 = vsub.f32 1.0, %v196_v13  ;;  %p411_p3 = pnand %p410_p2, %p406_p13 }
  0x1f   : > { %v187_v11 = vmul.f32 %v380_v3, %v186_v7 }
  0x20   : > { %176 = vadd.xlane.f32.xlu0 %v175_v1  ;;  %v198_v24 = vmul.f32 %v382_v9, %v197_v17 }
  0x21   : > { %v188_v15 = vadd.f32 %v380_v3, %v187_v11 }
  0x22   : > { %v199_v29 = vadd.f32 %v382_v9, %v198_v24 }
  0x23   : > { %v190_v21 = vsel %vm189_vm0, %v380_v3, %v188_v15 }
  0x24   : > { %v201_v33 = vsel %vm200_vm1, %v382_v9, %v199_v29 }
  0x8b   : > { %v168_v8 = vpop.xlane.xlu0 %167 }
  0x8c   : > { %v169_v10 = vrot.slane %v168_v8, 4 }
  0x8e   : > { %v170_v12 = vadd.f32 %v169_v10, %v168_v8 }
  0x90   : > { %v171_v14 = vrot.slane %v170_v12, 2 }
  0x92   : > { %v172_v16 = vadd.f32 %v171_v14, %v170_v12 }
  0x93   : > { %v177_v18 = vpop.xlane.xlu0 %176 }
  0x94   : > { %v173_v19 = vrot.slane %v172_v16, 1  ;;  %v178_v20 = vrot.slane %v177_v18, 4 }
  0x96   : > { %v174_v22 = vadd.f32 %v173_v19, %v172_v16  ;;  %v179_v23 = vadd.f32 %v178_v20, %v177_v18 }
  0x98   : > { %v191_v25 = vmul.f32 %v190_v21, %v174_v22  ;;  %v180_v26 = vrot.slane %v179_v23, 2 }
  0x9a   : > { %v192_v27 = vmul.f32 1024.0, %v191_v25  ;;  %v181_v28 = vadd.f32 %v180_v26, %v179_v23 }
  0x9c   : > { %v182_v30 = vrot.slane %v181_v28, 1  ;;  %v193_v31 = vmul.f32 %v192_v27, %v191_v25 }
  0x9e   : > { %v183_v32 = vadd.f32 %v182_v30, %v181_v28 }
  0xa0   : > { %v194_v34 = vsub.f32 %v183_v32, %v193_v31 }
  0xa2   : > { %v202_v35 = vmul.f32 %v201_v33, %v194_v34 }
  0xa4   : > { %v203_v36 = vmax.f32 %v202_v35, 0.0 }
  0xa6   : > { %383 = vrsqrt.f32 %v203_v36  ;;  %vm211_vm2 = vcmp.eq.f32.partialorder %v203_v36, inf  ;;  %v214_v44 = vand.u32 2147483648, %v203_v36  ;;  %vm213_vm3 = vcmp.eq.f32.partialorder %v203_v36, 0.0 }
  0xac   : > { %v384_v37 = vpop.eup %383 }
  0xad   : > { %v205_v38 = vmul.f32 %v384_v37, %v203_v36 }
  0xaf   : > { %v206_v39 = vmul.f32 %v384_v37, %v205_v38 }
  0xb1   : > { %v207_v40 = vmul.f32 0.5, %v206_v39 }
  0xb3   : > { %v208_v41 = vsub.f32 1.5, %v207_v40 }
  0xb5   : > { %v209_v42 = vmul.f32 %v384_v37, %v208_v41 }
  0xb7   : > { %v210_v43 = vmul.f32 %v209_v42, %v203_v36 }
  0xb9   : > { %v212_v45 = vsel %vm211_vm2, %v203_v36, %v210_v43 }
  0xba   : > { %v215_v46 = vsel %vm213_vm3, %v214_v44, %v212_v45 }
  0xbb   : > { %v216_v47 = vadd.f32 1e-05, %v215_v46 }
  0xbd   : > { %385 = vrcp.f32 %v216_v47  ;;  %v228_v51 = vand.u32 2147483648, %v216_v47  ;;  %v226_v53 = vand.u32 2147483647, %v216_v47  ;;  %vm222_vm5 = vweird.f32 %v216_v47 }
  0xbf   : > { %v229_v55 = vor.u32 1.1754944e-38, %v228_v51  ;;  %vm227_vm7 = vcmp.eq.f32.partialorder %v226_v53, 8.507059e+37 }
  0xc3   : > { %v386_v48 = vpop.eup %385 }
  0xc4   : > { %v218_v49 = vmul.f32 %v386_v48, %v216_v47  ;;  %vm223_vm4 = vweird.f32 %v386_v48 }
  0xc5   : > { %vm224_vm6 = vmor %vm222_vm5, %vm223_vm4 }
  0xc6   : > { %v219_v50 = vsub.f32 1.0, %v218_v49 }
  0xc8   : > { %v220_v52 = vmul.f32 %v386_v48, %v219_v50 }
  0xca   : > { %v221_v54 = vadd.f32 %v386_v48, %v220_v52 }
  0xcc   : > { %v225_v57 = vsel %vm224_vm6, %v386_v48, %v221_v54 }
  0xcd   : > { %v230_v58 = vsel %vm227_vm7, %v229_v55, %v225_v57 }
  0xce   : > { %v234_v59 = vmul.f32 %v232_v56, %v230_v58 }
  0xd0   : > { %239 = vperm.xlu1 %377, %v234_v59   ;;  %v235_v60 = vmul.f32 %v234_v59, %v191_v25 }
  0xd2   : > { %v236_v62 = vsub.f32 %v233_v61, %v235_v60 }
  0xd8   : > { %245 = vperm.xlu1 %377, %v236_v62  }
 0x142   : > { %v240_v63 = vpop.permute.xlu1 %239 }
 0x143   : > { %v242_v1 = vmul.f32 %v240_v63, %v527_v0 }
 0x14a   : > { %v246_v2 = vpop.permute.xlu1 %245 }
 0x14b   : > { %v248_v3 = vadd.f32 %v246_v2, %v242_v1 }
 0x14d   : > { %249 = vst [vmem:[%s161_s17] sm:$0xff] %v248_v3 }
 0x14e   : > { %414 = shalt.err (!%p411_p3)
}
 0x14f   : > { %335 = dma.vmem_to_hbm [thread:$0]  (%p512_p5), %s264_s19, 128, %s266_s20, %s251_s24  }
 0x150 PF: > { %p341_p4 = scmp.ge.s32.totalorder %s449_s15, 2  ;;  %s277_s4 = sand.u32 1, %s437_s12  }
 0x151   : > { %s278_s5 = scalar_lea.sflag [#allocation3], %s277_s4 }
 0x152   : > { %p338_p7 = pnand %p341_p4, %p516_p6 }
 0x154   : > { %p339_p8 = pneg %p338_p7 }
 0x156   : > { %432 = dma.done.wait (%p339_p8), %s278_s5, 128  }
 0x157   : > { %434 = vsyncadd (%p339_p8), %s278_s5, 4294967168  ;;  %p13_p9 = scmp.ge.s32.totalorder %s499_s18, 4   ;;  %s577_s12 = smov %s441_s13 }
 0x158   : > { %s578_s13 = smov %s445_s14  ;;  %s579_s14 = smov %s510_s21 }
 0x159   : > { %s580_s15 = smov %s499_s18  ;;  %15 = sbr.rel (!%p13_p9) target bundleno = 3 (0x3), region = 67 }
 0x15e   :  { %284 = vsyncpa [#allocation3], 1 }
 0x15f   :  { %286 = vsyncpa [#allocation3 + $0x1], 1 }

</bundles_post_ra>
